<compile_context>
chip_gen: v6e
topology: v6e:2x2x1
jax: 0.10.0
libtpu: 0.0.40
codegen_flags: <defaults>
</compile_context>

<pallas_src>
import jax
import jax.numpy as jnp
from jax.experimental import pallas as pl
from jax.experimental.pallas import tpu as pltpu

IN_F = 2     # layer1 in_features
HIDDEN = 8   # layer1 out_features / layer2 in_features


def mlp_kernel(x_ref, w1_ref, b1_ref, w2_ref, b2_ref, o_ref):
    # x_ref:  (2, TB)  VMEM, batch on lane axis
    # w1_ref: (2, 8)   SMEM  (in_features, hidden)
    # b1_ref: (1, 8)   SMEM
    # w2_ref: (1, 8)   SMEM  (weights of the single output unit)
    # b2_ref: (1, 1)   SMEM
    # o_ref:  (1, TB)  VMEM, batch on lane axis
    x0 = x_ref[0:1, :]                 # (1, TB) f32
    x1 = x_ref[1:2, :]                 # (1, TB) f32

    # Seed the accumulator with the layer-2 bias (saves a separate add/store).
    acc = jnp.full_like(x0, b2_ref[0, 0])

    # Statically unrolled VPU multiply-adds over the 8 hidden units:
    # per element ~ 8 * (2 mul + 2 add + max + mul + add) VPU ops, all on
    # (1, TB) lane-dense vregs; scalar SMEM reads ride the free scalar slots.
    for j in range(HIDDEN):
        h = x0 * w1_ref[0, j] + x1 * w1_ref[1, j] + b1_ref[0, j]
        h = jnp.maximum(h, 0.0)        # ReLU
        acc = acc + h * w2_ref[0, j]

    o_ref[...] = acc                   # single unmasked lane-dense store


def _round_up(n, m):
    return ((n + m - 1) // m) * m


def neural_net_forward(x, w1, b1, w2, b2, *, max_tile=1024):
    """x: (B, 2) float32.  w1: (2,8), b1: (1,8), w2: (1,8), b2: (1,1).
    Returns (B, 1) float32 = relu(x @ w1 + b1) @ w2.T + b2."""
    B = x.shape[0]
    # Lane-aligned batch tile; footprint stays tiny (far under v7x's 64 MiB VMEM).
    TB = min(max_tile, _round_up(B, 128))
    Bp = _round_up(B, TB)

    # Batch on lane axis, zero-padded to a whole number of tiles.
    xt = jnp.zeros((IN_F, Bp), jnp.float32).at[:, :B].set(
        x.astype(jnp.float32).T)

    cost = pl.CostEstimate(
        flops=57 * Bp,                               # ~57 VPU flops / element
        transcendentals=0,
        bytes_accessed=(IN_F + 1) * Bp * 4 + 33 * 4,
    )

    smem_spec = pl.BlockSpec(memory_space=pltpu.MemorySpace.SMEM)

    out = pl.pallas_call(
        mlp_kernel,
        out_shape=jax.ShapeDtypeStruct((1, Bp), jnp.float32),
        grid_spec=pltpu.PrefetchScalarGridSpec(
            num_scalar_prefetch=0,
            grid=(Bp // TB,),
            in_specs=[
                pl.BlockSpec((IN_F, TB), lambda i: (0, i)),   # x tile
                smem_spec,                                    # w1
                smem_spec,                                    # b1
                smem_spec,                                    # w2
                smem_spec,                                    # b2
            ],
            out_specs=pl.BlockSpec((1, TB), lambda i: (0, i)),
        ),
        compiler_params=pltpu.CompilerParams(
            dimension_semantics=("parallel",)),
        cost_estimate=cost,
    )(xt, w1, b1, w2, b2)

    # Back to PyTorch's (B, 1) convention.
    return out[0, :B].reshape(B, 1)


def init_params(key):
    """Deterministic init mimicking PyTorch nn.Linear default
    (uniform(-1/sqrt(fan_in), 1/sqrt(fan_in)))."""
    k1, k2, k3, k4 = jax.random.split(key, 4)
    bound1 = 1.0 / jnp.sqrt(2.0)   # fan_in = 2
    bound2 = 1.0 / jnp.sqrt(8.0)   # fan_in = 8
    w1 = jax.random.uniform(k1, (IN_F, HIDDEN), jnp.float32, -bound1, bound1)
    b1 = jax.random.uniform(k2, (1, HIDDEN), jnp.float32, -bound1, bound1)
    w2 = jax.random.uniform(k3, (1, HIDDEN), jnp.float32, -bound2, bound2)
    b2 = jax.random.uniform(k4, (1, 1), jnp.float32, -bound2, bound2)
    return w1, b1, w2, b2


if __name__ == "__main__":
    key = jax.random.PRNGKey(0)
    w1, b1, w2, b2 = init_params(key)

    # Same data as the original script: x = [[1,2],[3,4],[5,6],[7,8]]
    x = jnp.array([[1.0, 2.0], [3.0, 4.0], [5.0, 6.0], [7.0, 8.0]],
                  dtype=jnp.float32)

    out = neural_net_forward(x, w1, b1, w2, b2)
    jax.block_until_ready(out)

    # Reference check in plain JAX (same math as the PyTorch module).
    ref = jnp.maximum(x @ w1 + b1, 0.0) @ w2.T + b2
    assert out.shape == (4, 1)
    assert jnp.allclose(out, ref, atol=1e-5, rtol=1e-5), (out, ref)

    print("KERNEL_OK")
</pallas_src>

<mosaic_0001>
module attributes {stable_mosaic.version = 11 : i64} {
  func.func @mlp_kernel(%arg0: i32, %arg1: memref<2x128xf32, #tpu.memory_space<vmem>>, %arg2: memref<2x8xf32, #tpu.memory_space<smem>>, %arg3: memref<1x8xf32, #tpu.memory_space<smem>>, %arg4: memref<1x8xf32, #tpu.memory_space<smem>>, %arg5: memref<1x1xf32, #tpu.memory_space<smem>>, %arg6: memref<1x128xf32, #tpu.memory_space<vmem>>) attributes {dimension_semantics = [#tpu.dimension_semantics<parallel>], iteration_bounds = array<i64: 1>, scalar_prefetch = 0 : i64, scratch_operands = 0 : i64, tpu.core_type = #tpu.core_type<tc>, window_params = [{transform_indices = @transform_0, window_bounds = array<i64: 2, 128>}, {transform_indices = @transform_1, window_bounds = array<i64: 2, 8>}, {transform_indices = @transform_2, window_bounds = array<i64: 1, 8>}, {transform_indices = @transform_3, window_bounds = array<i64: 1, 8>}, {transform_indices = @transform_4, window_bounds = array<i64: 1, 1>}, {transform_indices = @transform_5, window_bounds = array<i64: 1, 128>}]} {
    %c0 = arith.constant 0 : index
    %c0_0 = arith.constant 0 : index
    %0 = vector.load %arg1[%c0, %c0_0] : memref<2x128xf32, #tpu.memory_space<vmem>>, vector<1x128xf32>
    %c1 = arith.constant 1 : index
    %c0_1 = arith.constant 0 : index
    %1 = vector.load %arg1[%c1, %c0_1] : memref<2x128xf32, #tpu.memory_space<vmem>>, vector<1x128xf32>
    %c0_2 = arith.constant 0 : index
    %c0_3 = arith.constant 0 : index
    %2 = memref.load %arg5[%c0_2, %c0_3] : memref<1x1xf32, #tpu.memory_space<smem>>
    %3 = vector.broadcast %2 : f32 to vector<1x128xf32>
    %c0_4 = arith.constant 0 : index
    %c0_5 = arith.constant 0 : index
    %4 = memref.load %arg2[%c0_4, %c0_5] : memref<2x8xf32, #tpu.memory_space<smem>>
    %5 = vector.broadcast %4 : f32 to vector<1x128xf32>
    %6 = arith.mulf %0, %5 : vector<1x128xf32>
    %c1_6 = arith.constant 1 : index
    %c0_7 = arith.constant 0 : index
    %7 = memref.load %arg2[%c1_6, %c0_7] : memref<2x8xf32, #tpu.memory_space<smem>>
    %8 = vector.broadcast %7 : f32 to vector<1x128xf32>
    %9 = arith.mulf %1, %8 : vector<1x128xf32>
    %10 = arith.addf %6, %9 : vector<1x128xf32>
    %c0_8 = arith.constant 0 : index
    %c0_9 = arith.constant 0 : index
    %11 = memref.load %arg3[%c0_8, %c0_9] : memref<1x8xf32, #tpu.memory_space<smem>>
    %12 = vector.broadcast %11 : f32 to vector<1x128xf32>
    %13 = arith.addf %10, %12 : vector<1x128xf32>
    %cst = arith.constant 0.000000e+00 : f32
    %14 = vector.broadcast %cst : f32 to vector<1x128xf32>
    %15 = arith.maximumf %13, %14 : vector<1x128xf32>
    %c0_10 = arith.constant 0 : index
    %c0_11 = arith.constant 0 : index
    %16 = memref.load %arg4[%c0_10, %c0_11] : memref<1x8xf32, #tpu.memory_space<smem>>
    %17 = vector.broadcast %16 : f32 to vector<1x128xf32>
    %18 = arith.mulf %15, %17 : vector<1x128xf32>
    %19 = arith.addf %3, %18 : vector<1x128xf32>
    %c0_12 = arith.constant 0 : index
    %c1_13 = arith.constant 1 : index
    %20 = memref.load %arg2[%c0_12, %c1_13] : memref<2x8xf32, #tpu.memory_space<smem>>
    %21 = vector.broadcast %20 : f32 to vector<1x128xf32>
    %22 = arith.mulf %0, %21 : vector<1x128xf32>
    %c1_14 = arith.constant 1 : index
    %c1_15 = arith.constant 1 : index
    %23 = memref.load %arg2[%c1_14, %c1_15] : memref<2x8xf32, #tpu.memory_space<smem>>
    %24 = vector.broadcast %23 : f32 to vector<1x128xf32>
    %25 = arith.mulf %1, %24 : vector<1x128xf32>
    %26 = arith.addf %22, %25 : vector<1x128xf32>
    %c0_16 = arith.constant 0 : index
    %c1_17 = arith.constant 1 : index
    %27 = memref.load %arg3[%c0_16, %c1_17] : memref<1x8xf32, #tpu.memory_space<smem>>
    %28 = vector.broadcast %27 : f32 to vector<1x128xf32>
    %29 = arith.addf %26, %28 : vector<1x128xf32>
    %cst_18 = arith.constant 0.000000e+00 : f32
    %30 = vector.broadcast %cst_18 : f32 to vector<1x128xf32>
    %31 = arith.maximumf %29, %30 : vector<1x128xf32>
    %c0_19 = arith.constant 0 : index
    %c1_20 = arith.constant 1 : index
    %32 = memref.load %arg4[%c0_19, %c1_20] : memref<1x8xf32, #tpu.memory_space<smem>>
    %33 = vector.broadcast %32 : f32 to vector<1x128xf32>
    %34 = arith.mulf %31, %33 : vector<1x128xf32>
    %35 = arith.addf %19, %34 : vector<1x128xf32>
    %c0_21 = arith.constant 0 : index
    %c2 = arith.constant 2 : index
    %36 = memref.load %arg2[%c0_21, %c2] : memref<2x8xf32, #tpu.memory_space<smem>>
    %37 = vector.broadcast %36 : f32 to vector<1x128xf32>
    %38 = arith.mulf %0, %37 : vector<1x128xf32>
    %c1_22 = arith.constant 1 : index
    %c2_23 = arith.constant 2 : index
    %39 = memref.load %arg2[%c1_22, %c2_23] : memref<2x8xf32, #tpu.memory_space<smem>>
    %40 = vector.broadcast %39 : f32 to vector<1x128xf32>
    %41 = arith.mulf %1, %40 : vector<1x128xf32>
    %42 = arith.addf %38, %41 : vector<1x128xf32>
    %c0_24 = arith.constant 0 : index
    %c2_25 = arith.constant 2 : index
    %43 = memref.load %arg3[%c0_24, %c2_25] : memref<1x8xf32, #tpu.memory_space<smem>>
    %44 = vector.broadcast %43 : f32 to vector<1x128xf32>
    %45 = arith.addf %42, %44 : vector<1x128xf32>
    %cst_26 = arith.constant 0.000000e+00 : f32
    %46 = vector.broadcast %cst_26 : f32 to vector<1x128xf32>
    %47 = arith.maximumf %45, %46 : vector<1x128xf32>
    %c0_27 = arith.constant 0 : index
    %c2_28 = arith.constant 2 : index
    %48 = memref.load %arg4[%c0_27, %c2_28] : memref<1x8xf32, #tpu.memory_space<smem>>
    %49 = vector.broadcast %48 : f32 to vector<1x128xf32>
    %50 = arith.mulf %47, %49 : vector<1x128xf32>
    %51 = arith.addf %35, %50 : vector<1x128xf32>
    %c0_29 = arith.constant 0 : index
    %c3 = arith.constant 3 : index
    %52 = memref.load %arg2[%c0_29, %c3] : memref<2x8xf32, #tpu.memory_space<smem>>
    %53 = vector.broadcast %52 : f32 to vector<1x128xf32>
    %54 = arith.mulf %0, %53 : vector<1x128xf32>
    %c1_30 = arith.constant 1 : index
    %c3_31 = arith.constant 3 : index
    %55 = memref.load %arg2[%c1_30, %c3_31] : memref<2x8xf32, #tpu.memory_space<smem>>
    %56 = vector.broadcast %55 : f32 to vector<1x128xf32>
    %57 = arith.mulf %1, %56 : vector<1x128xf32>
    %58 = arith.addf %54, %57 : vector<1x128xf32>
    %c0_32 = arith.constant 0 : index
    %c3_33 = arith.constant 3 : index
    %59 = memref.load %arg3[%c0_32, %c3_33] : memref<1x8xf32, #tpu.memory_space<smem>>
    %60 = vector.broadcast %59 : f32 to vector<1x128xf32>
    %61 = arith.addf %58, %60 : vector<1x128xf32>
    %cst_34 = arith.constant 0.000000e+00 : f32
    %62 = vector.broadcast %cst_34 : f32 to vector<1x128xf32>
    %63 = arith.maximumf %61, %62 : vector<1x128xf32>
    %c0_35 = arith.constant 0 : index
    %c3_36 = arith.constant 3 : index
    %64 = memref.load %arg4[%c0_35, %c3_36] : memref<1x8xf32, #tpu.memory_space<smem>>
    %65 = vector.broadcast %64 : f32 to vector<1x128xf32>
    %66 = arith.mulf %63, %65 : vector<1x128xf32>
    %67 = arith.addf %51, %66 : vector<1x128xf32>
    %c0_37 = arith.constant 0 : index
    %c4 = arith.constant 4 : index
    %68 = memref.load %arg2[%c0_37, %c4] : memref<2x8xf32, #tpu.memory_space<smem>>
    %69 = vector.broadcast %68 : f32 to vector<1x128xf32>
    %70 = arith.mulf %0, %69 : vector<1x128xf32>
    %c1_38 = arith.constant 1 : index
    %c4_39 = arith.constant 4 : index
    %71 = memref.load %arg2[%c1_38, %c4_39] : memref<2x8xf32, #tpu.memory_space<smem>>
    %72 = vector.broadcast %71 : f32 to vector<1x128xf32>
    %73 = arith.mulf %1, %72 : vector<1x128xf32>
    %74 = arith.addf %70, %73 : vector<1x128xf32>
    %c0_40 = arith.constant 0 : index
    %c4_41 = arith.constant 4 : index
    %75 = memref.load %arg3[%c0_40, %c4_41] : memref<1x8xf32, #tpu.memory_space<smem>>
    %76 = vector.broadcast %75 : f32 to vector<1x128xf32>
    %77 = arith.addf %74, %76 : vector<1x128xf32>
    %cst_42 = arith.constant 0.000000e+00 : f32
    %78 = vector.broadcast %cst_42 : f32 to vector<1x128xf32>
    %79 = arith.maximumf %77, %78 : vector<1x128xf32>
    %c0_43 = arith.constant 0 : index
    %c4_44 = arith.constant 4 : index
    %80 = memref.load %arg4[%c0_43, %c4_44] : memref<1x8xf32, #tpu.memory_space<smem>>
    %81 = vector.broadcast %80 : f32 to vector<1x128xf32>
    %82 = arith.mulf %79, %81 : vector<1x128xf32>
    %83 = arith.addf %67, %82 : vector<1x128xf32>
    %c0_45 = arith.constant 0 : index
    %c5 = arith.constant 5 : index
    %84 = memref.load %arg2[%c0_45, %c5] : memref<2x8xf32, #tpu.memory_space<smem>>
    %85 = vector.broadcast %84 : f32 to vector<1x128xf32>
    %86 = arith.mulf %0, %85 : vector<1x128xf32>
    %c1_46 = arith.constant 1 : index
    %c5_47 = arith.constant 5 : index
    %87 = memref.load %arg2[%c1_46, %c5_47] : memref<2x8xf32, #tpu.memory_space<smem>>
    %88 = vector.broadcast %87 : f32 to vector<1x128xf32>
    %89 = arith.mulf %1, %88 : vector<1x128xf32>
    %90 = arith.addf %86, %89 : vector<1x128xf32>
    %c0_48 = arith.constant 0 : index
    %c5_49 = arith.constant 5 : index
    %91 = memref.load %arg3[%c0_48, %c5_49] : memref<1x8xf32, #tpu.memory_space<smem>>
    %92 = vector.broadcast %91 : f32 to vector<1x128xf32>
    %93 = arith.addf %90, %92 : vector<1x128xf32>
    %cst_50 = arith.constant 0.000000e+00 : f32
    %94 = vector.broadcast %cst_50 : f32 to vector<1x128xf32>
    %95 = arith.maximumf %93, %94 : vector<1x128xf32>
    %c0_51 = arith.constant 0 : index
    %c5_52 = arith.constant 5 : index
    %96 = memref.load %arg4[%c0_51, %c5_52] : memref<1x8xf32, #tpu.memory_space<smem>>
    %97 = vector.broadcast %96 : f32 to vector<1x128xf32>
    %98 = arith.mulf %95, %97 : vector<1x128xf32>
    %99 = arith.addf %83, %98 : vector<1x128xf32>
    %c0_53 = arith.constant 0 : index
    %c6 = arith.constant 6 : index
    %100 = memref.load %arg2[%c0_53, %c6] : memref<2x8xf32, #tpu.memory_space<smem>>
    %101 = vector.broadcast %100 : f32 to vector<1x128xf32>
    %102 = arith.mulf %0, %101 : vector<1x128xf32>
    %c1_54 = arith.constant 1 : index
    %c6_55 = arith.constant 6 : index
    %103 = memref.load %arg2[%c1_54, %c6_55] : memref<2x8xf32, #tpu.memory_space<smem>>
    %104 = vector.broadcast %103 : f32 to vector<1x128xf32>
    %105 = arith.mulf %1, %104 : vector<1x128xf32>
    %106 = arith.addf %102, %105 : vector<1x128xf32>
    %c0_56 = arith.constant 0 : index
    %c6_57 = arith.constant 6 : index
    %107 = memref.load %arg3[%c0_56, %c6_57] : memref<1x8xf32, #tpu.memory_space<smem>>
    %108 = vector.broadcast %107 : f32 to vector<1x128xf32>
    %109 = arith.addf %106, %108 : vector<1x128xf32>
    %cst_58 = arith.constant 0.000000e+00 : f32
    %110 = vector.broadcast %cst_58 : f32 to vector<1x128xf32>
    %111 = arith.maximumf %109, %110 : vector<1x128xf32>
    %c0_59 = arith.constant 0 : index
    %c6_60 = arith.constant 6 : index
    %112 = memref.load %arg4[%c0_59, %c6_60] : memref<1x8xf32, #tpu.memory_space<smem>>
    %113 = vector.broadcast %112 : f32 to vector<1x128xf32>
    %114 = arith.mulf %111, %113 : vector<1x128xf32>
    %115 = arith.addf %99, %114 : vector<1x128xf32>
    %c0_61 = arith.constant 0 : index
    %c7 = arith.constant 7 : index
    %116 = memref.load %arg2[%c0_61, %c7] : memref<2x8xf32, #tpu.memory_space<smem>>
    %117 = vector.broadcast %116 : f32 to vector<1x128xf32>
    %118 = arith.mulf %0, %117 : vector<1x128xf32>
    %c1_62 = arith.constant 1 : index
    %c7_63 = arith.constant 7 : index
    %119 = memref.load %arg2[%c1_62, %c7_63] : memref<2x8xf32, #tpu.memory_space<smem>>
    %120 = vector.broadcast %119 : f32 to vector<1x128xf32>
    %121 = arith.mulf %1, %120 : vector<1x128xf32>
    %122 = arith.addf %118, %121 : vector<1x128xf32>
    %c0_64 = arith.constant 0 : index
    %c7_65 = arith.constant 7 : index
    %123 = memref.load %arg3[%c0_64, %c7_65] : memref<1x8xf32, #tpu.memory_space<smem>>
    %124 = vector.broadcast %123 : f32 to vector<1x128xf32>
    %125 = arith.addf %122, %124 : vector<1x128xf32>
    %cst_66 = arith.constant 0.000000e+00 : f32
    %126 = vector.broadcast %cst_66 : f32 to vector<1x128xf32>
    %127 = arith.maximumf %125, %126 : vector<1x128xf32>
    %c0_67 = arith.constant 0 : index
    %c7_68 = arith.constant 7 : index
    %128 = memref.load %arg4[%c0_67, %c7_68] : memref<1x8xf32, #tpu.memory_space<smem>>
    %129 = vector.broadcast %128 : f32 to vector<1x128xf32>
    %130 = arith.mulf %127, %129 : vector<1x128xf32>
    %131 = arith.addf %115, %130 : vector<1x128xf32>
    %c0_69 = arith.constant 0 : index
    %c0_70 = arith.constant 0 : index
    %132 = vector.load %arg6[%c0_69, %c0_70] : memref<1x128xf32, #tpu.memory_space<vmem>>, vector<1x128xf32>
    tpu.vector_store %arg6[%c0_69, %c0_70], %131 {strides = array<i32>} : memref<1x128xf32, #tpu.memory_space<vmem>>, vector<1x128xf32>,
    return
  }
  func.func @transform_0(%arg0: i32) -> (i32, i32) {
    %c0_i32 = arith.constant 0 : i32
    %c0_i32_0 = arith.constant 0 : i32
    return %c0_i32, %arg0 : i32, i32
  }
  func.func @transform_1(%arg0: i32) -> (i32, i32) {
    %c0_i32 = arith.constant 0 : i32
    %c0_i32_0 = arith.constant 0 : i32
    %c0_i32_1 = arith.constant 0 : i32
    return %c0_i32, %c0_i32_0 : i32, i32
  }
  func.func @transform_2(%arg0: i32) -> (i32, i32) {
    %c0_i32 = arith.constant 0 : i32
    %c0_i32_0 = arith.constant 0 : i32
    %c0_i32_1 = arith.constant 0 : i32
    return %c0_i32, %c0_i32_0 : i32, i32
  }
  func.func @transform_3(%arg0: i32) -> (i32, i32) {
    %c0_i32 = arith.constant 0 : i32
    %c0_i32_0 = arith.constant 0 : i32
    %c0_i32_1 = arith.constant 0 : i32
    return %c0_i32, %c0_i32_0 : i32, i32
  }
  func.func @transform_4(%arg0: i32) -> (i32, i32) {
    %c0_i32 = arith.constant 0 : i32
    %c0_i32_0 = arith.constant 0 : i32
    %c0_i32_1 = arith.constant 0 : i32
    return %c0_i32, %c0_i32_0 : i32, i32
  }
  func.func @transform_5(%arg0: i32) -> (i32, i32) {
    %c0_i32 = arith.constant 0 : i32
    %c0_i32_0 = arith.constant 0 : i32
    return %c0_i32, %arg0 : i32, i32
  }
}

</mosaic_0001>

<bundles_post_ra>
// kernel: tpu_custom_call.1
= control target key start
LH: loop header
LB: loop body
LE: loop exit
PB: predicated region body
PF: predicated region fallthrough
CT: control target
= control target key end

     0   :  { %11 = vsyncpa [#allocation5], 0  ;;  %s403_s0 = inlined_call_operand.vmem [shape: f32[2,128], index: 0, kind: input, shape index: {}]   ;;  %s404_s1 = inlined_call_operand.hbm [shape: f32[2,8], index: 1, kind: input, shape index: {}]   ;;  %s405_s2 = inlined_call_operand.vmem [shape: f32[1,8], index: 2, kind: input, shape index: {}]   ;;  %s406_s3 = inlined_call_operand.vmem [shape: f32[1,8], index: 3, kind: input, shape index: {}]   ;;  %s407_s4 = inlined_call_operand.<no memory space> [shape: f32[1,1], index: 4, kind: input, shape index: {}]   ;;  %s408_s5 = inlined_call_operand.hbm [shape: f32[1,128], index: 5, kind: output, shape index: {}]  }
   0x1   :  { %12 = vsyncpa [#allocation6], 0 }
   0x2   :  { %13 = vsyncpa [#allocation9], 0 }
   0x3   :  { %14 = vsyncpa [#allocation4], 0  ;;  %s31_s20 = sshll.u32 %s405_s2, 4  ;;  %s292_s21 = smov [#allocation3]   ;;  %s32_s20 = int_to_ptr.vmem [resolvable:$true] %s31_s20 }
   0x4   :  { %24 = dma.hbm_to_smem %s404_s1, 32, %s292_s21, [#allocation5]  }
   0x5   :  { %s240_s24 = scalar_lea.vmem %s32_s20, 16  ;;  %p245_p1 = scmp.lt.s32.totalorder %s32_s20, %s32_s20 }
   0x6   :  { %p241_p0 = scmp.ne.s32.totalorder %s32_s20, %s240_s24  ;;  %p246_p2 = scmp.lt.s32.totalorder %s240_s24, %s240_s24 }
   0x8   :  { %p247_p3 = por %p246_p2, %p245_p1 }
   0xa   :  { %p248_p4 = pnand %p247_p3, %p241_p0 }
   0xc   :  { %251 = shalt.err (!%p248_p4)
}
   0xd   :  { %s293_s25 = smov [#allocation7]   ;;  %s41_s28 = sshll.u32 %s406_s3, 4  ;;  %s42_s28 = int_to_ptr.vmem [resolvable:$true] %s41_s28 }
   0xe   :  { %34 = dma.vmem_to_smem %s32_s20, 16, %s293_s25, [#allocation6]  }
   0xf   :  { %s252_s2 = scalar_lea.vmem %s42_s28, 16  ;;  %p257_p6 = scmp.lt.s32.totalorder %s42_s28, %s42_s28 }
  0x10   :  { %p253_p5 = scmp.ne.s32.totalorder %s42_s28, %s252_s2  ;;  %p258_p7 = scmp.lt.s32.totalorder %s252_s2, %s252_s2 }
  0x12   :  { %p259_p8 = por %p258_p7, %p257_p6 }
  0x14   :  { %p260_p9 = pnand %p259_p8, %p253_p5 }
  0x16   :  { %263 = shalt.err (!%p260_p9)
}
  0x17   :  { %s294_s1 = smov [#allocation8]  }
  0x18   :  { %44 = dma.vmem_to_smem %s42_s28, 16, %s294_s1, [#allocation9]  }
  0x19   :  { %284 = dma.done.wait [#allocation5], 32  }
  0x1a   :  { %285 = vsyncadd [#allocation5], 4294967264 }
  0x1b   :  { %286 = dma.done.wait [#allocation6], 16  }
  0x1c   :  { %287 = vsyncadd [#allocation6], 4294967280 }
  0x1d   :  { %288 = dma.done.wait [#allocation9], 16  }
  0x1e   :  { %289 = vsyncadd [#allocation9], 4294967280 }
  0x1f   :  { %56 = sfence }
  0x20   :  { %s61_s29 = sld [smem:[#allocation3]]  ;;  %v340_v0 = vld [vmem:[%s403_s0] sm:$0x1]  ;;  %v345_v1 = vld [vmem:[%s403_s0 + $0x1] sm:$0x1]  ;;  %v60_v18 = vstv %s407_s4  ;;  %s295_s11 = smov [#allocation10]  }
  0x21   :  { %s199_s30 = sld [smem:[#allocation3 + $0x80]] }
  0x22   :  { %s68_s3 = sld [smem:[#allocation7]] }
  0x23   :  { %s335_s6 = sld [smem:[#allocation8]] }
  0x24   :  { %s200_s9 = sld [smem:[#allocation3 + $0x1]] }
  0x25   :  { %s201_s12 = sld [smem:[#allocation3 + $0x81]] }
  0x26   :  { %v62_v2 = vstv %s61_s29  ;;  %s202_s13 = sld [smem:[#allocation7 + $0x1]] }
  0x27   :  { %v63_v3 = vmul.f32 %v62_v2, %v340_v0  ;;  %v65_v4 = vstv %s199_s30  ;;  %s348_s14 = sld [smem:[#allocation8 + $0x1]] }
  0x28   :  { %v66_v5 = vmul.f32 %v65_v4, %v345_v1  ;;  %s204_s15 = sld [smem:[#allocation3 + $0x2]]  ;;  %v69_v6 = vstv %s68_s3 }
  0x29   :  { %s205_s16 = sld [smem:[#allocation3 + $0x82]]  ;;  %v73_v13 = vstv %s335_s6 }
  0x2a   :  { %v67_v7 = vadd.f32 %v66_v5, %v63_v3  ;;  %v77_v8 = vstv %s200_s9  ;;  %s351_s17 = sld [smem:[#allocation7 + $0x2]] }
  0x2b   :  { %v78_v9 = vmul.f32 %v77_v8, %v340_v0  ;;  %v80_v10 = vstv %s201_s12  ;;  %s354_s0 = sld [smem:[#allocation8 + $0x2]]  ;;  %s188_s12 = sshll.u32 %s295_s11, 4  ;;  %s189_s12 = int_to_ptr.vmem [resolvable:$true] %s188_s12 }
  0x2c   :  { %v70_v11 = vadd.f32 %v69_v6, %v67_v7  ;;  %v81_v12 = vmul.f32 %v80_v10, %v345_v1  ;;  %s208_s18 = sld [smem:[#allocation3 + $0x3]]  ;;  %v84_v14 = vstv %s202_s13  ;;  %s264_s13 = scalar_lea.vmem %s189_s12, 16 }
  0x2d   :  { %s209_s19 = sld [smem:[#allocation3 + $0x83]]  ;;  %v88_v24 = vstv %s348_s14  ;;  %p265_p10 = scmp.ne.s32.totalorder %s189_s12, %s264_s13 }
  0x2e   :  { %v71_v15 = vmax.f32 %v70_v11, 0.0  ;;  %v82_v16 = vadd.f32 %v81_v12, %v78_v9  ;;  %v92_v17 = vstv %s204_s15  ;;  %s358_s20 = sld [smem:[#allocation7 + $0x3]]  ;;  %s268_s14 = scalar_lea.vmem %s189_s12, 32 }
  0x2f   :  { %v93_v19 = vmul.f32 %v92_v17, %v340_v0  ;;  %v95_v20 = vstv %s205_s16  ;;  %s364_s23 = sld [smem:[#allocation8 + $0x3]]  ;;  %p269_p11 = scmp.lt.s32.totalorder %s189_s12, %s189_s12 }
  0x30   :  { %v74_v21 = vmul.f32 %v73_v13, %v71_v15  ;;  %v85_v22 = vadd.f32 %v84_v14, %v82_v16  ;;  %v96_v23 = vmul.f32 %v95_v20, %v345_v1  ;;  %s212_s24 = sld [smem:[#allocation3 + $0x4]]  ;;  %v99_v25 = vstv %s351_s17  ;;  %p270_p12 = scmp.lt.s32.totalorder %s268_s14, %s264_s13 }
  0x31   :  { %s213_s25 = sld [smem:[#allocation3 + $0x84]]  ;;  %v103_v35 = vstv %s354_s0 }
  0x32   :  { %v75_v26 = vadd.f32 %v74_v21, %v60_v18  ;;  %v86_v27 = vmax.f32 %v85_v22, 0.0  ;;  %v97_v28 = vadd.f32 %v96_v23, %v93_v19  ;;  %v107_v29 = vstv %s208_s18  ;;  %s369_s4 = sld [smem:[#allocation7 + $0x4]]  ;;  %p271_p13 = por %p270_p12, %p269_p11 }
  0x33   :  { %v108_v30 = vmul.f32 %v107_v29, %v340_v0  ;;  %v110_v31 = vstv %s209_s19  ;;  %s372_s26 = sld [smem:[#allocation8 + $0x4]] }
  0x34   :  { %v89_v32 = vmul.f32 %v88_v24, %v86_v27  ;;  %v100_v33 = vadd.f32 %v99_v25, %v97_v28  ;;  %v111_v34 = vmul.f32 %v110_v31, %v345_v1  ;;  %s216_s27 = sld [smem:[#allocation3 + $0x5]]  ;;  %v114_v36 = vstv %s358_s20  ;;  %p272_p0 = pnand %p271_p13, %p265_p10 }
  0x35   :  { %s217_s28 = sld [smem:[#allocation3 + $0x85]]  ;;  %v118_v46 = vstv %s364_s23 }
  0x36   :  { %v90_v37 = vadd.f32 %v89_v32, %v75_v26  ;;  %v101_v38 = vmax.f32 %v100_v33, 0.0  ;;  %v112_v39 = vadd.f32 %v111_v34, %v108_v30  ;;  %v122_v40 = vstv %s212_s24  ;;  %s377_s2 = sld [smem:[#allocation7 + $0x5]] }
  0x37   :  { %v123_v41 = vmul.f32 %v122_v40, %v340_v0  ;;  %v125_v42 = vstv %s213_s25  ;;  %s380_s1 = sld [smem:[#allocation8 + $0x5]] }
  0x38   :  { %v104_v43 = vmul.f32 %v103_v35, %v101_v38  ;;  %v115_v44 = vadd.f32 %v114_v36, %v112_v39  ;;  %v126_v45 = vmul.f32 %v125_v42, %v345_v1  ;;  %s220_s29 = sld [smem:[#allocation3 + $0x6]]  ;;  %v129_v47 = vstv %s369_s4 }
  0x39   :  { %s221_s30 = sld [smem:[#allocation3 + $0x86]]  ;;  %v133_v57 = vstv %s372_s26 }
  0x3a   :  { %v105_v48 = vadd.f32 %v104_v43, %v90_v37  ;;  %v116_v49 = vmax.f32 %v115_v44, 0.0  ;;  %v127_v50 = vadd.f32 %v126_v45, %v123_v41  ;;  %v137_v51 = vstv %s216_s27  ;;  %s385_s3 = sld [smem:[#allocation7 + $0x6]] }
  0x3b   :  { %v138_v52 = vmul.f32 %v137_v51, %v340_v0  ;;  %v140_v53 = vstv %s217_s28  ;;  %s388_s6 = sld [smem:[#allocation8 + $0x6]] }
  0x3c   :  { %v119_v54 = vmul.f32 %v118_v46, %v116_v49  ;;  %v130_v55 = vadd.f32 %v129_v47, %v127_v50  ;;  %v141_v56 = vmul.f32 %v140_v53, %v345_v1  ;;  %s224_s7 = sld [smem:[#allocation3 + $0x7]]  ;;  %v144_v58 = vstv %s377_s2 }
  0x3d   :  { %s225_s8 = sld [smem:[#allocation3 + $0x87]]  ;;  %v148_v6 = vstv %s380_s1 }
  0x3e   :  { %v120_v59 = vadd.f32 %v119_v54, %v105_v48  ;;  %v131_v60 = vmax.f32 %v130_v55, 0.0  ;;  %v142_v61 = vadd.f32 %v141_v56, %v138_v52  ;;  %v152_v62 = vstv %s220_s29  ;;  %s226_s9 = sld [smem:[#allocation7 + $0x7]] }
  0x3f   :  { %v153_v63 = vmul.f32 %v152_v62, %v340_v0  ;;  %v155_v2 = vstv %s221_s30  ;;  %s227_s10 = sld [smem:[#allocation8 + $0x7]] }
  0x40   :  { %v134_v3 = vmul.f32 %v133_v57, %v131_v60  ;;  %v145_v4 = vadd.f32 %v144_v58, %v142_v61  ;;  %v156_v5 = vmul.f32 %v155_v2, %v345_v1  ;;  %v159_v7 = vstv %s385_s3 }
  0x41   :  { %v163_v17 = vstv %s388_s6 }
  0x42   :  { %v135_v8 = vadd.f32 %v134_v3, %v120_v59  ;;  %v146_v9 = vmax.f32 %v145_v4, 0.0  ;;  %v157_v10 = vadd.f32 %v156_v5, %v153_v63  ;;  %v167_v11 = vstv %s224_s7 }
  0x43   :  { %v168_v12 = vmul.f32 %v167_v11, %v340_v0  ;;  %v170_v13 = vstv %s225_s8 }
  0x44   :  { %v149_v14 = vmul.f32 %v148_v6, %v146_v9  ;;  %v160_v15 = vadd.f32 %v159_v7, %v157_v10  ;;  %v171_v16 = vmul.f32 %v170_v13, %v345_v1  ;;  %v174_v18 = vstv %s226_s9 }
  0x45   :  { %v178_v24 = vstv %s227_s10 }
  0x46   :  { %v150_v19 = vadd.f32 %v149_v14, %v135_v8  ;;  %v161_v20 = vmax.f32 %v160_v15, 0.0  ;;  %v172_v21 = vadd.f32 %v171_v16, %v168_v12 }
  0x48   :  { %v164_v22 = vmul.f32 %v163_v17, %v161_v20  ;;  %v175_v23 = vadd.f32 %v174_v18, %v172_v21 }
  0x4a   :  { %v165_v25 = vadd.f32 %v164_v22, %v150_v19  ;;  %v176_v26 = vmax.f32 %v175_v23, 0.0 }
  0x4c   :  { %v179_v27 = vmul.f32 %v178_v24, %v176_v26 }
  0x4e   :  { %v180_v28 = vadd.f32 %v179_v27, %v165_v25 }
  0x50   :  { %181 = vst [vmem:[#allocation10] sm:$0x1] %v180_v28 }
  0x51   :  { %275 = shalt.err (!%p272_p0)
}
  0x52   :  { %191 = dma.vmem_to_hbm [thread:$0]  %s189_s12, 16, %s408_s5, [#allocation4]  }
  0x53   :  { %290 = dma.done.wait [#allocation4], 16  }
  0x54   :  { %291 = vsyncadd [#allocation4], 4294967280 }
  0x55   :  { %195 = vsyncpa [#allocation4], 1 }
  0x56   :  { %196 = vsyncpa [#allocation5], 1 }
  0x57   :  { %197 = vsyncpa [#allocation6], 1 }
  0x58   :  { %198 = vsyncpa [#allocation9], 1 }

</bundles_post_ra>
